<compile_context>
chip_gen: v7x
topology: tpu7x:2x2x1
jax: 0.10.0
libtpu: 0.0.40
codegen_flags: <defaults>
</compile_context>

<pallas_src>
import math

import jax
import jax.numpy as jnp
from jax.experimental import pallas as pl
from jax.experimental.pallas import tpu as pltpu


def _round_up(x, m):
    return ((x + m - 1) // m) * m


def _default_block_bytes():
    """Per-generation image block budget (bytes).  Conservative fallback: 2 MiB."""
    try:
        kind = jax.devices()[0].device_kind.lower()
    except Exception:
        return 2 << 20
    if "v5 lite" in kind or "v5e" in kind or "v5lite" in kind:
        return 1 << 20       # v5e: 16 MiB scoped VMEM default; ~0.8 TB/s HBM
    if "v7" in kind:
        return 4 << 20       # v7x: 3.2 TB/s/TC, 32 MiB scoped default
    return 2 << 20           # v6e and unknown


# --------------------------------------------------------------------------
# Kernel 1: channel gate, computed ONCE (tiny O(D^2) MLP).
# --------------------------------------------------------------------------
def channel_gate_kernel(text_ref, w1_ref, b1_ref, w2_ref, b2_ref, attn_ref):
    text = text_ref[...].astype(jnp.float32)                          # (S, D)
    text_mean = jnp.mean(text, axis=0, keepdims=True)                 # (1, D)
    h = jnp.dot(text_mean, w1_ref[...].astype(jnp.float32),
                preferred_element_type=jnp.float32) + b1_ref[...].astype(jnp.float32)
    h = jnp.maximum(h, 0.0)
    logits = jnp.dot(h, w2_ref[...].astype(jnp.float32),
                     preferred_element_type=jnp.float32) + b2_ref[...].astype(jnp.float32)
    attn_ref[...] = jax.nn.sigmoid(logits)                            # (1, D) f32


# --------------------------------------------------------------------------
# Kernel 2: streaming broadcast multiply (pure HBM bandwidth).
# --------------------------------------------------------------------------
def scale_kernel(gate_ref, img_ref, out_ref):
    # gate_ref: (1, lane_dim) in the image dtype, resident across the grid
    # (same block index every step => no re-DMA).
    out_ref[...] = img_ref[...] * gate_ref[...]


def inject_ca(image_feat, text_feat, w1, b1, w2, b2, *,
              target_block_bytes=None, donate_image=False):
    """image_feat: (B, N, D); text_feat: (S, D); w1,w2: (D, D) as (in,out); b1,b2: (1, D)."""
    B, N, D = image_feat.shape
    S, Dt = text_feat.shape
    assert Dt == D
    dtype = image_feat.dtype
    itemsize = jnp.dtype(dtype).itemsize
    if target_block_bytes is None:
        target_block_bytes = _default_block_bytes()

    # ---- 1) channel gate, computed once in a tiny Pallas call ----
    # Weights live whole in VMEM; fine for typical embed dims (D*D*4 bytes each).
    # TODO(synk): tile the gate MLP if D grows large enough to approach the
    # scoped VMEM limit (D >~ 1500); the gate is O(D^2) and off the hot path.
    attn = pl.pallas_call(
        channel_gate_kernel,
        out_shape=jax.ShapeDtypeStruct((1, D), jnp.float32),
    )(text_feat, w1, b1, w2, b2)

    # ---- 2) lane-dense packing factor: pack tokens so last dim is a
    #         multiple of 128 lanes (unmasked vst).
    pack = 128 // math.gcd(D, 128) if D % 128 != 0 else 1
    if pack > 32:          # pathological D: fall back to unpacked layout
        pack = 1
    lane_dim = D * pack

    # Gate in the image's native dtype (single cast), lane-tiled to match the
    # packed layout: a packed row is [tok0 D dims | tok1 D dims | ...].
    gate = attn.astype(dtype)
    if pack > 1:
        gate = jnp.tile(gate, (1, pack))                               # (1, lane_dim)

    # ---- 3) flatten image to token rows; pad only to a multiple of `pack`
    #         (usually zero rows — NOT to a tile multiple).
    rows = B * N
    img2d = image_feat.reshape(rows, D)
    pad_rows = (-rows) % pack
    if pad_rows:
        img2d = jnp.pad(img2d, ((0, pad_rows), (0, 0)))
    packed_rows = (rows + pad_rows) // pack
    img_packed = img2d.reshape(packed_rows, lane_dim)

    # ---- 4) row-tile size: aligned to the dtype's sublane packing and sized
    #         from the per-generation block budget.
    align = max(8, 32 // itemsize)          # f32: 8, bf16: 16, int8/fp8: 32
    bytes_per_row = lane_dim * itemsize
    tile_rows = max(align, (target_block_bytes // bytes_per_row) // align * align)
    tile_rows = min(tile_rows, _round_up(packed_rows, align))

    # Ragged last tile handled by Pallas: OOB reads padded, OOB writes dropped.
    grid = (pl.cdiv(packed_rows, tile_rows),)

    out_packed = pl.pallas_call(
        scale_kernel,
        out_shape=jax.ShapeDtypeStruct((packed_rows, lane_dim), dtype),
        grid=grid,
        in_specs=[
            pl.BlockSpec((1, lane_dim), lambda i: (0, 0)),             # gate (resident)
            pl.BlockSpec((tile_rows, lane_dim), lambda i: (i, 0)),     # image row tile
        ],
        out_specs=pl.BlockSpec((tile_rows, lane_dim), lambda i: (i, 0)),
        compiler_params=pltpu.CompilerParams(
            dimension_semantics=("parallel",)),                        # v7x megacore
        input_output_aliases=({1: 0} if donate_image else {}),
    )(gate, img_packed)

    out2d = out_packed.reshape(packed_rows * pack, D)
    if pad_rows:
        out2d = out2d[:rows]
    return out2d.reshape(B, N, D)


def init_params(key, embed_dim):
    """Deterministic init mimicking nn.Linear default (uniform +/- 1/sqrt(fan_in)).
    Weights stored as (in, out) so the kernel computes x @ W + b."""
    k1, k2, k3, k4 = jax.random.split(key, 4)
    bound = 1.0 / jnp.sqrt(embed_dim)
    w1 = jax.random.uniform(k1, (embed_dim, embed_dim), jnp.float32, -bound, bound)
    b1 = jax.random.uniform(k2, (1, embed_dim), jnp.float32, -bound, bound)
    w2 = jax.random.uniform(k3, (embed_dim, embed_dim), jnp.float32, -bound, bound)
    b2 = jax.random.uniform(k4, (1, embed_dim), jnp.float32, -bound, bound)
    return w1, b1, w2, b2


def inject_ca_reference(image_feat, text_feat, w1, b1, w2, b2):
    text_mean = jnp.mean(text_feat, axis=0, keepdims=True)
    h = jnp.maximum(text_mean @ w1 + b1, 0.0)
    attn = jax.nn.sigmoid(h @ w2 + b2)
    return image_feat * attn[None, :, :]


if __name__ == "__main__":
    key = jax.random.PRNGKey(0)
    k_img, k_txt, k_par, k_img2, k_txt2 = jax.random.split(key, 5)

    # Case 1: small canonical shapes (batch=2, image tokens=16, text tokens=8, D=32).
    B, N, S, D = 2, 16, 8, 32
    image_feat = jax.random.normal(k_img, (B, N, D), jnp.float32)
    text_feat = jax.random.normal(k_txt, (S, D), jnp.float32)
    w1, b1, w2, b2 = init_params(k_par, D)

    out = jax.block_until_ready(inject_ca(image_feat, text_feat, w1, b1, w2, b2))
    ref = inject_ca_reference(image_feat, text_feat, w1, b1, w2, b2)
    assert out.shape == image_feat.shape
    assert jnp.allclose(out, ref, atol=1e-5, rtol=1e-5), "mismatch vs reference (case 1)"

    # Case 2: multi-tile grid with a ragged last tile (verifies OOB writes are
    # dropped when packed_rows is not a multiple of tile_rows).
    B2, N2 = 2, 100   # rows=200 -> packed_rows=50, tile_rows=8 -> grid=7, ragged tail
    image_feat2 = jax.random.normal(k_img2, (B2, N2, D), jnp.float32)
    text_feat2 = jax.random.normal(k_txt2, (S, D), jnp.float32)
    out2 = jax.block_until_ready(
        inject_ca(image_feat2, text_feat2, w1, b1, w2, b2, target_block_bytes=4096))
    ref2 = inject_ca_reference(image_feat2, text_feat2, w1, b1, w2, b2)
    assert out2.shape == image_feat2.shape
    assert jnp.allclose(out2, ref2, atol=1e-5, rtol=1e-5), "mismatch vs reference (case 2)"

    print("KERNEL_OK")
</pallas_src>

<mosaic_0001>
module attributes {stable_mosaic.version = 11 : i64} {
  func.func @channel_gate_kernel(%arg0: memref<8x32xf32, #tpu.memory_space<vmem>>, %arg1: memref<32x32xf32, #tpu.memory_space<vmem>>, %arg2: memref<1x32xf32, #tpu.memory_space<vmem>>, %arg3: memref<32x32xf32, #tpu.memory_space<vmem>>, %arg4: memref<1x32xf32, #tpu.memory_space<vmem>>, %arg5: memref<1x32xf32, #tpu.memory_space<vmem>>) attributes {dimension_semantics = [], scalar_prefetch = 0 : i64, scratch_operands = 0 : i64, tpu.core_type = #tpu.core_type<tc>} {
    %c0 = arith.constant 0 : index
    %c0_0 = arith.constant 0 : index
    %0 = vector.load %arg0[%c0, %c0_0] : memref<8x32xf32, #tpu.memory_space<vmem>>, vector<8x32xf32>
    %cst = arith.constant dense<0.000000e+00> : vector<32xf32>
    %1 = vector.multi_reduction <add>, %0, %cst [0] : vector<8x32xf32> to vector<32xf32>
    %2 = vector.shape_cast %1 : vector<32xf32> to vector<1x32xf32>
    %cst_1 = arith.constant 8.000000e+00 : f32
    %3 = vector.broadcast %cst_1 : f32 to vector<1x32xf32>
    %4 = arith.divf %2, %3 : vector<1x32xf32>
    %c0_2 = arith.constant 0 : index
    %c0_3 = arith.constant 0 : index
    %5 = vector.load %arg1[%c0_2, %c0_3] : memref<32x32xf32, #tpu.memory_space<vmem>>, vector<32x32xf32>
    %cst_4 = arith.constant dense<0.000000e+00> : vector<1x32xf32>
    %6 = tpu.matmul %4, %5, %cst_4 {dimension_numbers = #tpu.dot_dimension_numbers<[1], [0], [0], [1], [0, 0, 1, 1], [], []>} : vector<1x32xf32>, vector<32x32xf32>, vector<1x32xf32> -> vector<1x32xf32>
    %c0_5 = arith.constant 0 : index
    %c0_6 = arith.constant 0 : index
    %7 = vector.load %arg2[%c0_5, %c0_6] : memref<1x32xf32, #tpu.memory_space<vmem>>, vector<1x32xf32>
    %8 = arith.addf %6, %7 : vector<1x32xf32>
    %cst_7 = arith.constant 0.000000e+00 : f32
    %9 = vector.broadcast %cst_7 : f32 to vector<1x32xf32>
    %10 = arith.maximumf %8, %9 : vector<1x32xf32>
    %c0_8 = arith.constant 0 : index
    %c0_9 = arith.constant 0 : index
    %11 = vector.load %arg3[%c0_8, %c0_9] : memref<32x32xf32, #tpu.memory_space<vmem>>, vector<32x32xf32>
    %cst_10 = arith.constant dense<0.000000e+00> : vector<1x32xf32>
    %12 = tpu.matmul %10, %11, %cst_10 {dimension_numbers = #tpu.dot_dimension_numbers<[1], [0], [0], [1], [0, 0, 1, 1], [], []>} : vector<1x32xf32>, vector<32x32xf32>, vector<1x32xf32> -> vector<1x32xf32>
    %c0_11 = arith.constant 0 : index
    %c0_12 = arith.constant 0 : index
    %13 = vector.load %arg4[%c0_11, %c0_12] : memref<1x32xf32, #tpu.memory_space<vmem>>, vector<1x32xf32>
    %14 = arith.addf %12, %13 : vector<1x32xf32>
    %15 = arith.negf %14 : vector<1x32xf32>
    %16 = math.exp %15 : vector<1x32xf32>
    %cst_13 = arith.constant 1.000000e+00 : f32
    %17 = vector.broadcast %cst_13 : f32 to vector<1x32xf32>
    %18 = arith.addf %17, %16 : vector<1x32xf32>
    %19 = arith.divf %17, %18 : vector<1x32xf32>
    %c0_14 = arith.constant 0 : index
    %c0_15 = arith.constant 0 : index
    %20 = vector.load %arg5[%c0_14, %c0_15] : memref<1x32xf32, #tpu.memory_space<vmem>>, vector<1x32xf32>
    tpu.vector_store %arg5[%c0_14, %c0_15], %19 {strides = array<i32>} : memref<1x32xf32, #tpu.memory_space<vmem>>, vector<1x32xf32>,
    return
  }
}

</mosaic_0001>

<bundles_post_ra>
// kernel: tpu_custom_call.1
= control target key start
LH: loop header
LB: loop body
LE: loop exit
PB: predicated region body
PF: predicated region fallthrough
CT: control target
= control target key end

     0   :  { %10 = vsyncpa [#allocation3], 0  ;;  %s508_s0 = inlined_call_operand.hbm [shape: f32[8,32], index: 0, kind: input, shape index: {}]   ;;  %s509_s1 = inlined_call_operand.hbm [shape: f32[32,32], index: 1, kind: input, shape index: {}]   ;;  %s510_s2 = inlined_call_operand.vmem [shape: f32[1,32], index: 2, kind: input, shape index: {}]   ;;  %s511_s3 = inlined_call_operand.hbm [shape: f32[32,32], index: 3, kind: input, shape index: {}]   ;;  %s512_s4 = inlined_call_operand.vmem [shape: f32[1,32], index: 4, kind: input, shape index: {}]   ;;  %s513_s5 = inlined_call_operand.hbm [shape: f32[1,32], index: 5, kind: output, shape index: {}]  }
   0x1   :  { %11 = vsyncpa [#allocation6], 0 }
   0x2   :  { %12 = vsyncpa [#allocation4], 0  ;;  %s406_s18 = smov [#allocation5]   ;;  %s312_s22 = scalar_lea.hbm %s509_s1, 512 }
   0x3   :  { %s28_s19 = sshll.u32 %s406_s18, 4  ;;  %p313_p0 = scmp.ne.s32.totalorder %s509_s1, %s312_s22  ;;  %s29_s19 = int_to_ptr.vmem [resolvable:$true] %s28_s19 }
   0x4   :  { %p316_p1 = scmp.lt.u32.totalorder %s312_s22, %s509_s1 }
   0x6   :  { %p318_p2 = pnand %p316_p1, %p313_p0 }
   0x8   :  { %321 = shalt.err (!%p318_p2)
}
   0x9   :  { %s322_s27 = scalar_lea.vmem %s29_s19, 512  ;;  %p327_p4 = scmp.lt.s32.totalorder %s29_s19, %s29_s19 }
   0xa   :  { %p323_p3 = scmp.ne.s32.totalorder %s29_s19, %s322_s27  ;;  %p328_p5 = scmp.lt.s32.totalorder %s322_s27, %s322_s27 }
   0xc   :  { %p329_p6 = por %p328_p5, %p327_p4 }
   0xe   :  { %p330_p7 = pnand %p329_p6, %p323_p3 }
  0x10   :  { %333 = shalt.err (!%p330_p7)
}
  0x11   :  { %s407_s28 = smov 128   ;;  %s408_s29 = smov 8  }
  0x12   :  { %34 = dma.hbm_to_vmem [thread:$0]  %s509_s1, 512, %s29_s19, [#allocation6], %s407_s28, %s407_s28, %s408_s29  }
  0x13   :  { %s409_s7 = smov [#allocation2]   ;;  %s410_s9 = smov [#allocation7]  }
  0x14   :  { %s19_s8 = sshll.u32 %s409_s7, 4  ;;  %s42_s10 = sshll.u32 %s410_s9, 4  ;;  %s20_s8 = int_to_ptr.vmem [resolvable:$true] %s19_s8  ;;  %s43_s10 = int_to_ptr.vmem [resolvable:$true] %s42_s10 }
  0x15   :  { %s334_s13 = scalar_lea.hbm %s508_s0, 128 }
  0x16   :  { %p335_p8 = scmp.ne.s32.totalorder %s508_s0, %s334_s13  ;;  %p338_p9 = scmp.lt.u32.totalorder %s334_s13, %s508_s0 }
  0x18   :  { %p340_p10 = pnand %p338_p9, %p335_p8 }
  0x1a   :  { %343 = shalt.err (!%p340_p10)
}
  0x1b   :  { %s344_s1 = scalar_lea.vmem %s20_s8, 128  ;;  %p349_p12 = scmp.lt.s32.totalorder %s20_s8, %s20_s8 }
  0x1c   :  { %p345_p11 = scmp.ne.s32.totalorder %s20_s8, %s344_s1  ;;  %p350_p13 = scmp.lt.s32.totalorder %s344_s1, %s344_s1 }
  0x1e   :  { %p351_p0 = por %p350_p13, %p349_p12 }
  0x20   :  { %p352_p1 = pnand %p351_p0, %p345_p11 }
  0x22   :  { %355 = shalt.err (!%p352_p1)
}
  0x23   :  { %22 = dma.hbm_to_vmem [thread:$0]  %s508_s0, 128, %s20_s8, [#allocation3]  }
  0x24   :  { %s356_s22 = scalar_lea.hbm %s511_s3, 512 }
  0x25   :  { %p357_p2 = scmp.ne.s32.totalorder %s511_s3, %s356_s22  ;;  %p360_p3 = scmp.lt.u32.totalorder %s356_s22, %s511_s3 }
  0x27   :  { %p362_p4 = pnand %p360_p3, %p357_p2 }
  0x29   :  { %365 = shalt.err (!%p362_p4)
}
  0x2a   :  { %s366_s27 = scalar_lea.vmem %s43_s10, 512  ;;  %p371_p6 = scmp.lt.s32.totalorder %s43_s10, %s43_s10 }
  0x2b   :  { %p367_p5 = scmp.ne.s32.totalorder %s43_s10, %s366_s27  ;;  %p372_p7 = scmp.lt.s32.totalorder %s366_s27, %s366_s27 }
  0x2d   :  { %p373_p8 = por %p372_p7, %p371_p6 }
  0x2f   :  { %p374_p9 = pnand %p373_p8, %p367_p5 }
  0x31   :  { %377 = shalt.err (!%p374_p9)
}
  0x32   :  { %48 = dma.hbm_to_vmem [thread:$0]  %s511_s3, 512, %s43_s10, [#allocation6], %s407_s28, %s407_s28, %s408_s29  }
  0x33   :  { %400 = dma.done.wait [#allocation3], 128  }
  0x34   :  { %401 = vsyncadd [#allocation3], 4294967168 }
  0x35   :  { %402 = dma.done.wait [#allocation6], 1024  }
  0x36   :  { %403 = vsyncadd [#allocation6], 4294966272  ;;  %v411_v0 = vmov 0.0|0.0   ;;  %vm412_vm0 = vmmov 0   ;;  %v413_v1 = vmov 0.0   ;;  %vm61_vm1 = vcmask 261120  }
  0x37   :  { %287 = vmatprep.subr.bf16.mxu0 %v411_v0  ;;  %273 = vmatprep.mubr.msk.f32.mxu0 %vm412_vm0, %v413_v1  ;;  %v71_v2 = vld [vmem:[#allocation5] sm:$0xff]  ;;  %v72_v3 = vld [vmem:[#allocation5 + $0x8] sm:$0xff]  ;;  %v73_v4 = vld [vmem:[#allocation5 + $0x10] sm:$0xff]  ;;  %s414_s7 = smov [#allocation8]   ;;  %vm234_vm2 = vcmask 253952  }
  0x38   :  { %293 = vmatprep.subr.bf16.mxu1 %v411_v0  ;;  %284 = vmatprep.mubr.msk.f32.mxu1 %vm412_vm0, %v413_v1  ;;  %v288_v5 = vpack.c.bf16 %v72_v3, %v71_v2  ;;  %v74_v6 = vld [vmem:[#allocation5 + $0x18] sm:$0xff]  ;;  %v150_v8 = vld [vmem:[#allocation7] sm:$0xff]  ;;  %v151_v10 = vld [vmem:[#allocation7 + $0x8] sm:$0xff] }
  0x39   :  { %v60_v7 = vld [vmem:[#allocation2] sm:$0xff]  ;;  %v291_v11 = vpack.c.bf16 %v74_v6, %v73_v4  ;;  %v294_v13 = vpack.c.bf16 %v151_v10, %v150_v8  ;;  %v152_v20 = vld [vmem:[#allocation7 + $0x10] sm:$0xff] }
  0x3a   :  { %v62_v9 = vsel %vm61_vm1, %v60_v7, 0.0  ;;  %289 = vmatpush3.bf16.msra.mxu0 %v288_v5  ;;  %v153_v21 = vld [vmem:[#allocation7 + $0x18] sm:$0xff] }
  0x3b   :  { %v63_v12 = vrot.slane %v62_v9, 4  ;;  %290 = vmatprep.subr.bf16.mxu0 %v411_v0  ;;  %295 = vmatpush3.bf16.msra.mxu1 %v294_v13  ;;  %v297_v22 = vpack.c.bf16 %v153_v21, %v152_v20  ;;  %v75_v23 = vld [vmem:[%s510_s2] sm:$0x1]  ;;  %s242_s2 = sshll.u32 %s414_s7, 4  ;;  %s243_s2 = int_to_ptr.vmem [resolvable:$true] %s242_s2 }
  0x3c   :  { %296 = vmatprep.subr.bf16.mxu1 %v411_v0  ;;  %v154_v28 = vld [vmem:[%s512_s4] sm:$0x1]  ;;  %s378_s8 = scalar_lea.vmem %s243_s2, 16  ;;  %s382_s9 = scalar_lea.vmem %s243_s2, 32 }
  0x3d   :  { %v64_v14 = vadd.f32 %v63_v12, %v62_v9  ;;  %p379_p10 = scmp.ne.s32.totalorder %s243_s2, %s378_s8  ;;  %p383_p11 = scmp.lt.s32.totalorder %s243_s2, %s243_s2 }
  0x3e   :  { %292 = vmatpush3.bf16.msra.mxu0 %v291_v11  ;;  %p384_p12 = scmp.lt.s32.totalorder %s382_s9, %s378_s8 }
  0x3f   :  { %v65_v15 = vrot.slane %v64_v14, 2  ;;  %298 = vmatpush3.bf16.msra.mxu1 %v297_v22 }
  0x40   :  { %p385_p13 = por %p384_p12, %p383_p11 }
  0x41   :  { %v66_v16 = vadd.f32 %v65_v15, %v64_v14 }
  0x42   :  { %p386_p0 = pnand %p385_p13, %p379_p10 }
  0x43   :  { %v67_v17 = vrot.slane %v66_v16, 1 }
  0x45   :  { %v68_v18 = vadd.f32 %v67_v17, %v66_v16 }
  0x47   :  { %v70_v19 = vmul.f32 0.125, %v68_v18 }
  0x49   :  { %274 = vmatmul.mubr.msk.f32.vlgmr.msra.gmra.mrb[0].mxu0 %vm61_vm1, %v70_v19 }
 0x11c   :  { %v145_v24 = vpop.f32.mrb[0].mxu0 }
 0x11d   :  { %v146_v25 = vadd.f32 %v145_v24, %v75_v23  ;;  %v275_v26 = vpop.f32.mrb[1].mxu0 }
 0x11f   :  { %v149_v27 = vmax.f32 %v146_v25, 0.0 }
 0x121   :  { %285 = vmatmul.mubr.msk.f32.vlgmr.msra.gmra.mrb[0].mxu1 %vm61_vm1, %v149_v27 }
 0x1f4   :  { %v224_v29 = vpop.f32.mrb[0].mxu1 }
 0x1f5   :  { %v225_v30 = vadd.f32 %v224_v29, %v154_v28  ;;  %v286_v31 = vpop.f32.mrb[1].mxu1 }
 0x1f7   :  { %v254_v32 = vmul.f32 -1.442695, %v225_v30 }
 0x1f9   :  { %308 = vpow2.f32 %v254_v32 }
 0x203   :  { %v309_v33 = vpop.eup %308 }
 0x204   :  { %v231_v34 = vadd.f32 1.0, %v309_v33 }
 0x206   :  { %310 = vrcp.f32 %v231_v34 }
 0x210   :  { %v311_v35 = vpop.eup %310 }
 0x211   :  { %235 = vst.msk [vmem:[#allocation8] sm:$0x1] %vm234_vm2, %v311_v35 }
 0x212   :  { %389 = shalt.err (!%p386_p0)
}
 0x213   :  { %s390_s11 = scalar_lea.hbm %s513_s5, 16 }
 0x214   :  { %p391_p1 = scmp.ne.s32.totalorder %s513_s5, %s390_s11  ;;  %p394_p2 = scmp.lt.u32.totalorder %s390_s11, %s513_s5 }
 0x216   :  { %p396_p3 = pnand %p394_p2, %p391_p1 }
 0x218   :  { %399 = shalt.err (!%p396_p3)
}
 0x219   :  { %245 = dma.vmem_to_hbm [thread:$0]  %s243_s2, 16, %s513_s5, [#allocation4]  }
 0x21a   :  { %404 = dma.done.wait [#allocation4], 16  }
 0x21b   :  { %405 = vsyncadd [#allocation4], 4294967280 }
 0x21c   :  { %249 = vsyncpa [#allocation3], 1 }
 0x21d   :  { %250 = vsyncpa [#allocation6], 1 }
 0x21e   :  { %251 = vsyncpa [#allocation4], 1 }

</bundles_post_ra>
